<compile_context>
chip_gen: v6e
topology: v6e:2x2x1
jax: 0.10.0
libtpu: 0.0.40
codegen_flags: <defaults>
</compile_context>

<pallas_src>
import jax
import jax.numpy as jnp
from jax.experimental import pallas as pl
from jax.experimental.pallas import tpu as pltpu

BN_EPS = 1e-5


def meta_kernel(inp_ref, tbl_ref, aff_ref, lin_ref, out_ref):
    """inp: (B, 3)        [age, sex, site] as f32
       tbl: (13, K_pad)   rows [age_0, age_1, age_nan, sex_w(3), site_w(7)],
                          each row non-zero only in its lane range
       aff: (2, K_pad)    [gamma, beta], zero in padded lanes
       lin: (K_pad+1, out_pad)  W.T rows (zero for padded lanes) + bias row
       out: (B, out_pad)"""
    Kp = lin_ref.shape[0] - 1                           # lane-padded width (static)

    # ---- age branch (elementwise, VPU) ----
    age = inp_ref[:, 0:1] / 100.0                       # (B, 1)
    is_nan = jnp.isnan(age)
    age = jnp.where(is_nan, 0.0, age)                   # age[isnan] = 0
    age_nan = tbl_ref[2:3, :]
    age_0 = jnp.where(is_nan, age_nan, tbl_ref[0:1, :])     # (B, K_pad)
    age_1 = jnp.where(is_nan, age_nan, tbl_ref[1:2, :])     # (B, K_pad)
    x = age_0 * (1.0 - age) + age_1 * age                    # lerp; 0 outside age lanes

    # ---- embeddings as chained VPU selects (rows live in disjoint lane ranges) ----
    sex = inp_ref[:, 1:2]                               # (B, 1) f32, exact ints
    site = inp_ref[:, 2:3]
    sex_feat = jnp.where(sex == 0.0, tbl_ref[3:4, :], 0.0)
    for k in (1, 2):
        sex_feat = jnp.where(sex == float(k), tbl_ref[3 + k:4 + k, :], sex_feat)
    site_feat = jnp.where(site == 0.0, tbl_ref[6:7, :], 0.0)
    for k in range(1, 7):
        site_feat = jnp.where(site == float(k), tbl_ref[6 + k:7 + k, :], site_feat)

    # lane-offset packed "concat": plain full-vreg adds, no lane shifts / XLU.
    x = x + sex_feat + site_feat                        # (B, K_pad)

    # ---- fused BatchNorm1d (train mode, two-pass biased var) + ReLU ----
    inv_b = 1.0 / x.shape[0]
    mean = jnp.sum(x, axis=0, keepdims=True) * inv_b
    xc = x - mean
    var = jnp.sum(xc * xc, axis=0, keepdims=True) * inv_b
    xn = xc * jax.lax.rsqrt(var + BN_EPS)               # EUP rsqrt
    xn = xn * aff_ref[0:1, :] + aff_ref[1:2, :]
    xn = jnp.maximum(xn, 0.0)                           # padded lanes stay exactly 0

    # ---- single MXU matmul against lane-dense padded W.T, + bias ----
    # TODO(synk): large-B path should cast xn / W.T to bf16 before the dot.
    out_ref[...] = (jnp.dot(xn, lin_ref[:Kp, :], preferred_element_type=jnp.float32)
                    + lin_ref[Kp:Kp + 1, :])


def pack_meta_params(params):
    """Build the lane-offset parameter slabs ONCE (hoisted out of the forward)."""
    mid = params["age_0"].shape[1]
    out_f = params["w"].shape[0]
    K = 3 * mid
    k_pad = ((K + 127) // 128) * 128                    # lane-dense contraction dim
    out_pad = ((out_f + 127) // 128) * 128              # lane-dense output width

    tbl = jnp.zeros((13, k_pad), jnp.float32)
    tbl = tbl.at[0, :mid].set(params["age_0"][0])
    tbl = tbl.at[1, :mid].set(params["age_1"][0])
    tbl = tbl.at[2, :mid].set(params["age_nan"][0])
    tbl = tbl.at[3:6, mid:2 * mid].set(params["sex_w"])
    tbl = tbl.at[6:13, 2 * mid:3 * mid].set(params["site_w"])

    aff = jnp.zeros((2, k_pad), jnp.float32)            # zero gamma/beta in pad lanes
    aff = aff.at[0, :K].set(params["gamma"])
    aff = aff.at[1, :K].set(params["beta"])

    lin = jnp.zeros((k_pad + 1, out_pad), jnp.float32)  # zero W.T rows for pad lanes
    lin = lin.at[:K, :out_f].set(params["w"].T)
    lin = lin.at[k_pad, :out_f].set(params["b"])        # bias row
    return tbl, aff, lin, out_f


@jax.jit
def _meta_forward_padded(age, sex, site, tbl, aff, lin):
    B = age.shape[0]
    k_pad = tbl.shape[1]
    out_pad = lin.shape[1]

    # per-call glue: only the data-dependent input packing remains here
    inp = jnp.stack([age.astype(jnp.float32),
                     sex.astype(jnp.float32),
                     site.astype(jnp.float32)], axis=1)      # (B, 3)

    cost = pl.CostEstimate(
        flops=2 * B * k_pad * out_pad + 20 * B * k_pad,
        transcendentals=k_pad,
        bytes_accessed=4 * (inp.size + tbl.size + aff.size + lin.size + B * out_pad),
    )
    work_bytes = 4 * (inp.size + tbl.size + aff.size + lin.size
                      + B * out_pad + 4 * B * k_pad)
    vmem_limit = int(min(max(2 * work_bytes, 32 * 1024 * 1024), 100 * 1024 * 1024))

    vmem = pl.BlockSpec(memory_space=pltpu.MemorySpace.VMEM)
    return pl.pallas_call(
        meta_kernel,
        out_shape=jax.ShapeDtypeStruct((B, out_pad), jnp.float32),
        in_specs=[vmem, vmem, vmem, vmem],
        out_specs=vmem,
        cost_estimate=cost,
        compiler_params=pltpu.CompilerParams(vmem_limit_bytes=vmem_limit),
    )(inp, tbl, aff, lin)


def meta_forward(age, sex, site, packed):
    """age: (B,) f32 (may contain NaN); sex/site: (B,) int; packed: pack_meta_params(...)."""
    tbl, aff, lin, out_f = packed
    out = _meta_forward_padded(age, sex, site, tbl, aff, lin)
    # Consumers that tolerate the 128-wide slab should take `out` directly and
    # fuse this slice into the next op (saves a full read+copy at large B).
    return out[:, :out_f]


def meta_reference(age, sex, site, p):
    """Pure-JAX reference mirroring the PyTorch forward (train-mode BN)."""
    a = (age / 100.0)[:, None]
    nan = jnp.isnan(a)
    a = jnp.where(nan, 0.0, a)
    age_0 = jnp.where(nan, p["age_nan"], p["age_0"])
    age_1 = jnp.where(nan, p["age_nan"], p["age_1"])
    age_feat = age_0 * (1.0 - a) + age_1 * a
    sex_feat = p["sex_w"][sex]
    site_feat = p["site_w"][site]
    x = jnp.concatenate([age_feat, sex_feat, site_feat], axis=1)
    mean = jnp.mean(x, axis=0, keepdims=True)
    var = jnp.mean((x - mean) ** 2, axis=0, keepdims=True)
    x = (x - mean) / jnp.sqrt(var + BN_EPS)
    x = x * p["gamma"][None, :] + p["beta"][None, :]
    x = jnp.maximum(x, 0.0)
    hi = jax.lax.Precision.HIGHEST
    return jnp.dot(x, p["w"].T, precision=hi) + p["b"][None, :]


if __name__ == "__main__":
    B, mid, out_f = 8, 32, 16

    key = jax.random.PRNGKey(0)
    ks = jax.random.split(key, 10)

    params = {
        "age_0":   jax.random.normal(ks[0], (1, mid), jnp.float32),
        "age_1":   jax.random.normal(ks[1], (1, mid), jnp.float32),
        # age_nan is left uninitialized in the torch module; init normal here
        "age_nan": jax.random.normal(ks[2], (1, mid), jnp.float32),
        "sex_w":   jax.random.normal(ks[3], (3, mid), jnp.float32),
        "site_w":  jax.random.normal(ks[4], (7, mid), jnp.float32),
        "gamma":   jnp.ones((3 * mid,), jnp.float32),     # BatchNorm1d weight init
        "beta":    jnp.zeros((3 * mid,), jnp.float32),    # BatchNorm1d bias init
        # kaiming_normal_(nonlinearity='linear'): std = 1/sqrt(fan_in)
        "w": jax.random.normal(ks[5], (out_f, 3 * mid), jnp.float32)
             / jnp.sqrt(jnp.float32(3 * mid)),
        # nn.Linear default bias init: U(-1/sqrt(fan_in), 1/sqrt(fan_in))
        "b": jax.random.uniform(ks[6], (out_f,), jnp.float32,
                                minval=-1.0 / (3 * mid) ** 0.5,
                                maxval=1.0 / (3 * mid) ** 0.5),
    }

    age = jax.random.uniform(ks[7], (B,), jnp.float32, minval=1.0, maxval=90.0)
    age = age.at[1].set(jnp.nan).at[5].set(jnp.nan)       # exercise the NaN path
    sex = jax.random.randint(ks[8], (B,), 0, 3, dtype=jnp.int32)
    site = jax.random.randint(ks[9], (B,), 0, 7, dtype=jnp.int32)

    packed = jax.block_until_ready(pack_meta_params(params))   # one-time packing
    out = jax.block_until_ready(meta_forward(age, sex, site, packed))
    ref = jax.block_until_ready(meta_reference(age, sex, site, params))

    assert out.shape == (B, out_f) and out.dtype == jnp.float32
    assert jnp.allclose(out, ref, rtol=2e-3, atol=2e-3), (
        f"mismatch: max abs err {jnp.max(jnp.abs(out - ref))}")
    print("KERNEL_OK")
</pallas_src>

<mosaic_0001>
module attributes {stable_mosaic.version = 11 : i64} {
  func.func @meta_kernel(%arg0: memref<8x3xf32, #tpu.memory_space<vmem>>, %arg1: memref<13x128xf32, #tpu.memory_space<vmem>>, %arg2: memref<2x128xf32, #tpu.memory_space<vmem>>, %arg3: memref<129x128xf32, #tpu.memory_space<vmem>>, %arg4: memref<8x128xf32, #tpu.memory_space<vmem>>) attributes {dimension_semantics = [], scalar_prefetch = 0 : i64, scratch_operands = 0 : i64, tpu.core_type = #tpu.core_type<tc>} {
    %c0 = arith.constant 0 : index
    %c0_0 = arith.constant 0 : index
    %0 = vector.load %arg0[%c0, %c0_0] : memref<8x3xf32, #tpu.memory_space<vmem>>, vector<8x1xf32>
    %cst = arith.constant 1.000000e+02 : f32
    %1 = vector.broadcast %cst : f32 to vector<8x1xf32>
    %2 = arith.divf %0, %1 : vector<8x1xf32>
    %3 = arith.cmpf one, %2, %2 : vector<8x1xf32>
    %cst_1 = arith.constant 0.000000e+00 : f32
    %4 = vector.broadcast %cst_1 : f32 to vector<8x1xf32>
    %5 = arith.select %3, %4, %2 : vector<8x1xi1>, vector<8x1xf32>
    %c2 = arith.constant 2 : index
    %c0_2 = arith.constant 0 : index
    %6 = vector.load %arg1[%c2, %c0_2] : memref<13x128xf32, #tpu.memory_space<vmem>>, vector<1x128xf32>
    %c0_3 = arith.constant 0 : index
    %c0_4 = arith.constant 0 : index
    %7 = vector.load %arg1[%c0_3, %c0_4] : memref<13x128xf32, #tpu.memory_space<vmem>>, vector<1x128xf32>
    %8 = vector.shape_cast %3 : vector<8x1xi1> to vector<8x1xi1>
    %9 = vector.broadcast %8 : vector<8x1xi1> to vector<8x128xi1>
    %10 = vector.shape_cast %6 : vector<1x128xf32> to vector<1x128xf32>
    %11 = vector.broadcast %10 : vector<1x128xf32> to vector<8x128xf32>
    %12 = vector.shape_cast %7 : vector<1x128xf32> to vector<1x128xf32>
    %13 = vector.broadcast %12 : vector<1x128xf32> to vector<8x128xf32>
    %14 = arith.select %9, %11, %13 : vector<8x128xi1>, vector<8x128xf32>
    %c1 = arith.constant 1 : index
    %c0_5 = arith.constant 0 : index
    %15 = vector.load %arg1[%c1, %c0_5] : memref<13x128xf32, #tpu.memory_space<vmem>>, vector<1x128xf32>
    %16 = vector.shape_cast %3 : vector<8x1xi1> to vector<8x1xi1>
    %17 = vector.broadcast %16 : vector<8x1xi1> to vector<8x128xi1>
    %18 = vector.shape_cast %6 : vector<1x128xf32> to vector<1x128xf32>
    %19 = vector.broadcast %18 : vector<1x128xf32> to vector<8x128xf32>
    %20 = vector.shape_cast %15 : vector<1x128xf32> to vector<1x128xf32>
    %21 = vector.broadcast %20 : vector<1x128xf32> to vector<8x128xf32>
    %22 = arith.select %17, %19, %21 : vector<8x128xi1>, vector<8x128xf32>
    %cst_6 = arith.constant 1.000000e+00 : f32
    %23 = vector.broadcast %cst_6 : f32 to vector<8x1xf32>
    %24 = arith.subf %23, %5 : vector<8x1xf32>
    %25 = vector.broadcast %24 : vector<8x1xf32> to vector<8x128xf32>
    %26 = arith.mulf %14, %25 : vector<8x128xf32>
    %27 = vector.broadcast %5 : vector<8x1xf32> to vector<8x128xf32>
    %28 = arith.mulf %22, %27 : vector<8x128xf32>
    %29 = arith.addf %26, %28 : vector<8x128xf32>
    %c0_7 = arith.constant 0 : index
    %c1_8 = arith.constant 1 : index
    %30 = vector.load %arg0[%c0_7, %c1_8] : memref<8x3xf32, #tpu.memory_space<vmem>>, vector<8x1xf32>
    %c0_9 = arith.constant 0 : index
    %c2_10 = arith.constant 2 : index
    %31 = vector.load %arg0[%c0_9, %c2_10] : memref<8x3xf32, #tpu.memory_space<vmem>>, vector<8x1xf32>
    %cst_11 = arith.constant 0.000000e+00 : f32
    %32 = vector.broadcast %cst_11 : f32 to vector<8x1xf32>
    %33 = arith.cmpf oeq, %30, %32 : vector<8x1xf32>
    %c3 = arith.constant 3 : index
    %c0_12 = arith.constant 0 : index
    %34 = vector.load %arg1[%c3, %c0_12] : memref<13x128xf32, #tpu.memory_space<vmem>>, vector<1x128xf32>
    %cst_13 = arith.constant 0.000000e+00 : f32
    %35 = vector.shape_cast %33 : vector<8x1xi1> to vector<8x1xi1>
    %36 = vector.broadcast %35 : vector<8x1xi1> to vector<8x128xi1>
    %37 = vector.shape_cast %34 : vector<1x128xf32> to vector<1x128xf32>
    %38 = vector.broadcast %37 : vector<1x128xf32> to vector<8x128xf32>
    %39 = vector.broadcast %cst_13 : f32 to vector<8x128xf32>
    %40 = arith.select %36, %38, %39 : vector<8x128xi1>, vector<8x128xf32>
    %cst_14 = arith.constant 1.000000e+00 : f32
    %41 = vector.broadcast %cst_14 : f32 to vector<8x1xf32>
    %42 = arith.cmpf oeq, %30, %41 : vector<8x1xf32>
    %c4 = arith.constant 4 : index
    %c0_15 = arith.constant 0 : index
    %43 = vector.load %arg1[%c4, %c0_15] : memref<13x128xf32, #tpu.memory_space<vmem>>, vector<1x128xf32>
    %44 = vector.shape_cast %42 : vector<8x1xi1> to vector<8x1xi1>
    %45 = vector.broadcast %44 : vector<8x1xi1> to vector<8x128xi1>
    %46 = vector.shape_cast %43 : vector<1x128xf32> to vector<1x128xf32>
    %47 = vector.broadcast %46 : vector<1x128xf32> to vector<8x128xf32>
    %48 = arith.select %45, %47, %40 : vector<8x128xi1>, vector<8x128xf32>
    %cst_16 = arith.constant 2.000000e+00 : f32
    %49 = vector.broadcast %cst_16 : f32 to vector<8x1xf32>
    %50 = arith.cmpf oeq, %30, %49 : vector<8x1xf32>
    %c5 = arith.constant 5 : index
    %c0_17 = arith.constant 0 : index
    %51 = vector.load %arg1[%c5, %c0_17] : memref<13x128xf32, #tpu.memory_space<vmem>>, vector<1x128xf32>
    %52 = vector.shape_cast %50 : vector<8x1xi1> to vector<8x1xi1>
    %53 = vector.broadcast %52 : vector<8x1xi1> to vector<8x128xi1>
    %54 = vector.shape_cast %51 : vector<1x128xf32> to vector<1x128xf32>
    %55 = vector.broadcast %54 : vector<1x128xf32> to vector<8x128xf32>
    %56 = arith.select %53, %55, %48 : vector<8x128xi1>, vector<8x128xf32>
    %cst_18 = arith.constant 0.000000e+00 : f32
    %57 = vector.broadcast %cst_18 : f32 to vector<8x1xf32>
    %58 = arith.cmpf oeq, %31, %57 : vector<8x1xf32>
    %c6 = arith.constant 6 : index
    %c0_19 = arith.constant 0 : index
    %59 = vector.load %arg1[%c6, %c0_19] : memref<13x128xf32, #tpu.memory_space<vmem>>, vector<1x128xf32>
    %cst_20 = arith.constant 0.000000e+00 : f32
    %60 = vector.shape_cast %58 : vector<8x1xi1> to vector<8x1xi1>
    %61 = vector.broadcast %60 : vector<8x1xi1> to vector<8x128xi1>
    %62 = vector.shape_cast %59 : vector<1x128xf32> to vector<1x128xf32>
    %63 = vector.broadcast %62 : vector<1x128xf32> to vector<8x128xf32>
    %64 = vector.broadcast %cst_20 : f32 to vector<8x128xf32>
    %65 = arith.select %61, %63, %64 : vector<8x128xi1>, vector<8x128xf32>
    %cst_21 = arith.constant 1.000000e+00 : f32
    %66 = vector.broadcast %cst_21 : f32 to vector<8x1xf32>
    %67 = arith.cmpf oeq, %31, %66 : vector<8x1xf32>
    %c7 = arith.constant 7 : index
    %c0_22 = arith.constant 0 : index
    %68 = vector.load %arg1[%c7, %c0_22] : memref<13x128xf32, #tpu.memory_space<vmem>>, vector<1x128xf32>
    %69 = vector.shape_cast %67 : vector<8x1xi1> to vector<8x1xi1>
    %70 = vector.broadcast %69 : vector<8x1xi1> to vector<8x128xi1>
    %71 = vector.shape_cast %68 : vector<1x128xf32> to vector<1x128xf32>
    %72 = vector.broadcast %71 : vector<1x128xf32> to vector<8x128xf32>
    %73 = arith.select %70, %72, %65 : vector<8x128xi1>, vector<8x128xf32>
    %cst_23 = arith.constant 2.000000e+00 : f32
    %74 = vector.broadcast %cst_23 : f32 to vector<8x1xf32>
    %75 = arith.cmpf oeq, %31, %74 : vector<8x1xf32>
    %c8 = arith.constant 8 : index
    %c0_24 = arith.constant 0 : index
    %76 = vector.load %arg1[%c8, %c0_24] : memref<13x128xf32, #tpu.memory_space<vmem>>, vector<1x128xf32>
    %77 = vector.shape_cast %75 : vector<8x1xi1> to vector<8x1xi1>
    %78 = vector.broadcast %77 : vector<8x1xi1> to vector<8x128xi1>
    %79 = vector.shape_cast %76 : vector<1x128xf32> to vector<1x128xf32>
    %80 = vector.broadcast %79 : vector<1x128xf32> to vector<8x128xf32>
    %81 = arith.select %78, %80, %73 : vector<8x128xi1>, vector<8x128xf32>
    %cst_25 = arith.constant 3.000000e+00 : f32
    %82 = vector.broadcast %cst_25 : f32 to vector<8x1xf32>
    %83 = arith.cmpf oeq, %31, %82 : vector<8x1xf32>
    %c9 = arith.constant 9 : index
    %c0_26 = arith.constant 0 : index
    %84 = vector.load %arg1[%c9, %c0_26] : memref<13x128xf32, #tpu.memory_space<vmem>>, vector<1x128xf32>
    %85 = vector.shape_cast %83 : vector<8x1xi1> to vector<8x1xi1>
    %86 = vector.broadcast %85 : vector<8x1xi1> to vector<8x128xi1>
    %87 = vector.shape_cast %84 : vector<1x128xf32> to vector<1x128xf32>
    %88 = vector.broadcast %87 : vector<1x128xf32> to vector<8x128xf32>
    %89 = arith.select %86, %88, %81 : vector<8x128xi1>, vector<8x128xf32>
    %cst_27 = arith.constant 4.000000e+00 : f32
    %90 = vector.broadcast %cst_27 : f32 to vector<8x1xf32>
    %91 = arith.cmpf oeq, %31, %90 : vector<8x1xf32>
    %c10 = arith.constant 10 : index
    %c0_28 = arith.constant 0 : index
    %92 = vector.load %arg1[%c10, %c0_28] : memref<13x128xf32, #tpu.memory_space<vmem>>, vector<1x128xf32>
    %93 = vector.shape_cast %91 : vector<8x1xi1> to vector<8x1xi1>
    %94 = vector.broadcast %93 : vector<8x1xi1> to vector<8x128xi1>
    %95 = vector.shape_cast %92 : vector<1x128xf32> to vector<1x128xf32>
    %96 = vector.broadcast %95 : vector<1x128xf32> to vector<8x128xf32>
    %97 = arith.select %94, %96, %89 : vector<8x128xi1>, vector<8x128xf32>
    %cst_29 = arith.constant 5.000000e+00 : f32
    %98 = vector.broadcast %cst_29 : f32 to vector<8x1xf32>
    %99 = arith.cmpf oeq, %31, %98 : vector<8x1xf32>
    %c11 = arith.constant 11 : index
    %c0_30 = arith.constant 0 : index
    %100 = vector.load %arg1[%c11, %c0_30] : memref<13x128xf32, #tpu.memory_space<vmem>>, vector<1x128xf32>
    %101 = vector.shape_cast %99 : vector<8x1xi1> to vector<8x1xi1>
    %102 = vector.broadcast %101 : vector<8x1xi1> to vector<8x128xi1>
    %103 = vector.shape_cast %100 : vector<1x128xf32> to vector<1x128xf32>
    %104 = vector.broadcast %103 : vector<1x128xf32> to vector<8x128xf32>
    %105 = arith.select %102, %104, %97 : vector<8x128xi1>, vector<8x128xf32>
    %cst_31 = arith.constant 6.000000e+00 : f32
    %106 = vector.broadcast %cst_31 : f32 to vector<8x1xf32>
    %107 = arith.cmpf oeq, %31, %106 : vector<8x1xf32>
    %c12 = arith.constant 12 : index
    %c0_32 = arith.constant 0 : index
    %108 = vector.load %arg1[%c12, %c0_32] : memref<13x128xf32, #tpu.memory_space<vmem>>, vector<1x128xf32>
    %109 = vector.shape_cast %107 : vector<8x1xi1> to vector<8x1xi1>
    %110 = vector.broadcast %109 : vector<8x1xi1> to vector<8x128xi1>
    %111 = vector.shape_cast %108 : vector<1x128xf32> to vector<1x128xf32>
    %112 = vector.broadcast %111 : vector<1x128xf32> to vector<8x128xf32>
    %113 = arith.select %110, %112, %105 : vector<8x128xi1>, vector<8x128xf32>
    %114 = arith.addf %29, %56 : vector<8x128xf32>
    %115 = arith.addf %114, %113 : vector<8x128xf32>
    %cst_33 = arith.constant dense<0.000000e+00> : vector<128xf32>
    %116 = vector.multi_reduction <add>, %115, %cst_33 [0] : vector<8x128xf32> to vector<128xf32>
    %117 = vector.shape_cast %116 : vector<128xf32> to vector<1x128xf32>
    %cst_34 = arith.constant 1.250000e-01 : f32
    %118 = vector.broadcast %cst_34 : f32 to vector<1x128xf32>
    %119 = arith.mulf %117, %118 : vector<1x128xf32>
    %120 = vector.broadcast %119 : vector<1x128xf32> to vector<8x128xf32>
    %121 = arith.subf %115, %120 : vector<8x128xf32>
    %122 = arith.mulf %121, %121 : vector<8x128xf32>
    %cst_35 = arith.constant dense<0.000000e+00> : vector<128xf32>
    %123 = vector.multi_reduction <add>, %122, %cst_35 [0] : vector<8x128xf32> to vector<128xf32>
    %124 = vector.shape_cast %123 : vector<128xf32> to vector<1x128xf32>
    %cst_36 = arith.constant 1.250000e-01 : f32
    %125 = vector.broadcast %cst_36 : f32 to vector<1x128xf32>
    %126 = arith.mulf %124, %125 : vector<1x128xf32>
    %cst_37 = arith.constant 9.99999974E-6 : f32
    %127 = vector.broadcast %cst_37 : f32 to vector<1x128xf32>
    %128 = arith.addf %126, %127 : vector<1x128xf32>
    %129 = math.rsqrt %128 : vector<1x128xf32>
    %130 = vector.broadcast %129 : vector<1x128xf32> to vector<8x128xf32>
    %131 = arith.mulf %121, %130 : vector<8x128xf32>
    %c0_38 = arith.constant 0 : index
    %c0_39 = arith.constant 0 : index
    %132 = vector.load %arg2[%c0_38, %c0_39] : memref<2x128xf32, #tpu.memory_space<vmem>>, vector<1x128xf32>
    %133 = vector.broadcast %132 : vector<1x128xf32> to vector<8x128xf32>
    %134 = arith.mulf %131, %133 : vector<8x128xf32>
    %c1_40 = arith.constant 1 : index
    %c0_41 = arith.constant 0 : index
    %135 = vector.load %arg2[%c1_40, %c0_41] : memref<2x128xf32, #tpu.memory_space<vmem>>, vector<1x128xf32>
    %136 = vector.broadcast %135 : vector<1x128xf32> to vector<8x128xf32>
    %137 = arith.addf %134, %136 : vector<8x128xf32>
    %cst_42 = arith.constant 0.000000e+00 : f32
    %138 = vector.broadcast %cst_42 : f32 to vector<8x128xf32>
    %139 = arith.maximumf %137, %138 : vector<8x128xf32>
    %c0_43 = arith.constant 0 : index
    %c0_44 = arith.constant 0 : index
    %140 = vector.load %arg3[%c0_43, %c0_44] : memref<129x128xf32, #tpu.memory_space<vmem>>, vector<128x128xf32>
    %cst_45 = arith.constant dense<0.000000e+00> : vector<8x128xf32>
    %141 = tpu.matmul %139, %140, %cst_45 {dimension_numbers = #tpu.dot_dimension_numbers<[1], [0], [0], [1], [0, 0, 1, 1], [], []>} : vector<8x128xf32>, vector<128x128xf32>, vector<8x128xf32> -> vector<8x128xf32>
    %c128 = arith.constant 128 : index
    %c0_46 = arith.constant 0 : index
    %142 = vector.load %arg3[%c128, %c0_46] : memref<129x128xf32, #tpu.memory_space<vmem>>, vector<1x128xf32>
    %143 = vector.broadcast %142 : vector<1x128xf32> to vector<8x128xf32>
    %144 = arith.addf %141, %143 : vector<8x128xf32>
    %c0_47 = arith.constant 0 : index
    %c0_48 = arith.constant 0 : index
    %145 = vector.load %arg4[%c0_47, %c0_48] : memref<8x128xf32, #tpu.memory_space<vmem>>, vector<8x128xf32>
    tpu.vector_store %arg4[%c0_47, %c0_48], %144 {strides = array<i32>} : memref<8x128xf32, #tpu.memory_space<vmem>>, vector<8x128xf32>,
    return
  }
}

</mosaic_0001>

<bundles_post_ra>
// kernel: _meta_forward_padded.1
= control target key start
LH: loop header
LB: loop body
LE: loop exit
PB: predicated region body
PF: predicated region fallthrough
CT: control target
= control target key end

     0   :  { %9 = vsyncpa [#allocation3], 0  ;;  %s546_s0 = inlined_call_operand.vmem [shape: f32[8,3], index: 0, kind: input, shape index: {}]   ;;  %s547_s1 = inlined_call_operand.vmem [shape: f32[13,128], index: 1, kind: input, shape index: {}]   ;;  %s548_s2 = inlined_call_operand.vmem [shape: f32[2,128], index: 2, kind: input, shape index: {}]   ;;  %s549_s3 = inlined_call_operand.hbm [shape: f32[129,128], index: 3, kind: input, shape index: {}]   ;;  %s550_s4 = inlined_call_operand.hbm [shape: f32[8,128], index: 4, kind: output, shape index: {}]  }
   0x1   :  { %10 = vsyncpa [#allocation4], 0  ;;  %s458_s15 = smov [#allocation2]  }
   0x2   :  { %s22_s16 = sshll.u32 %s458_s15, 4  ;;  %s23_s16 = int_to_ptr.vmem [resolvable:$true] %s22_s16 }
   0x3   :  { %s422_s17 = scalar_lea.vmem %s23_s16, 2176  ;;  %p427_p1 = scmp.lt.s32.totalorder %s23_s16, %s23_s16 }
   0x4   :  { %p423_p0 = scmp.ne.s32.totalorder %s23_s16, %s422_s17  ;;  %p428_p2 = scmp.lt.s32.totalorder %s422_s17, %s422_s17 }
   0x6   :  { %p429_p3 = por %p428_p2, %p427_p1 }
   0x8   :  { %p430_p4 = pnand %p429_p3, %p423_p0 }
   0xa   :  { %433 = shalt.err (!%p430_p4)
}
   0xb   :  { %s459_s18 = smov 128   ;;  %s460_s19 = smov 8  }
   0xc   :  { %28 = dma.hbm_to_vmem [thread:$0]  %s549_s3, 2176, %s23_s16, [#allocation3], %s459_s18, %s459_s18, %s460_s19  }
   0xd   :  { %454 = dma.done.wait [#allocation3], 2176  }
   0xe   :  { %455 = vsyncadd [#allocation3], 4294965120  ;;  %v461_v0 = vmov 2   ;;  %v462_v1 = vmov 1   ;;  %v32_v2 = vld [vmem:[%s546_s0] sm:$0xff]  ;;  %v463_v4 = vmov 0  }
   0xf   :  { %405 = vset.pattern.permute.xlu1 %v461_v0  ;;  %406 = vset.pattern.permute.xlu0 %v462_v1  ;;  %vm85_vm0 = vcmp.eq.f32.partialorder %v32_v2, 1.0  ;;  %vm73_vm1 = vcmp.eq.f32.partialorder %v32_v2, 0.0  ;;  %vm97_vm2 = vcmp.eq.f32.partialorder %v32_v2, 2.0  ;;  %v34_v3 = vmul.f32 0.01, %v32_v2  ;;  %v236_v16 = vld [vmem:[#allocation2 + $0x78] sm:$0xff] }
  0x10   :  { %v87_v5 = vsel %vm85_vm0, 1, %v463_v4  ;;  %v75_v6 = vsel %vm73_vm1, 1, %v463_v4  ;;  %v99_v7 = vsel %vm97_vm2, 1, %v463_v4  ;;  %vm139_vm4 = vcmp.eq.f32.partialorder %v32_v2, 3.0  ;;  %v235_v17 = vld [vmem:[#allocation2 + $0x70] sm:$0xff]  ;;  %v234_v18 = vld [vmem:[#allocation2 + $0x68] sm:$0xff] }
  0x11   :  { %121 = vperm.xlu1 %405, %v87_v5   ;;  %77 = vperm.xlu0 %406, %v75_v6   ;;  %vm35_vm3 = vcmp.ne.f32.partialorder %v34_v3, %v34_v3  ;;  %v141_v11 = vsel %vm139_vm4, 1, %v463_v4  ;;  %vm163_vm5 = vcmp.eq.f32.partialorder %v32_v2, 5.0  ;;  %vm151_vm6 = vcmp.eq.f32.partialorder %v32_v2, 4.0  ;;  %v233_v19 = vld [vmem:[#allocation2 + $0x60] sm:$0xff]  ;;  %v232_v20 = vld [vmem:[#allocation2 + $0x58] sm:$0xff]  ;;  %v231_v21 = vld [vmem:[#allocation2 + $0x50] sm:$0xff] }
  0x12   :  { %v39_v8 = vsel %vm35_vm3, 1, %v463_v4  ;;  %v36_v9 = vsel %vm35_vm3, 0.0, %v34_v3  ;;  %v165_v12 = vsel %vm163_vm5, 1, %v463_v4  ;;  %v153_v13 = vsel %vm151_vm6, 1, %v463_v4  ;;  %v230_v22 = vld [vmem:[#allocation2 + $0x48] sm:$0xff]  ;;  %v229_v23 = vld [vmem:[#allocation2 + $0x40] sm:$0xff] }
  0x13   :  { %v59_v10 = vsub.f32 1.0, %v36_v9  ;;  %vm175_vm7 = vcmp.eq.f32.partialorder %v32_v2, 6.0  ;;  %v464_v15 = vmov 0.0   ;;  %vm465_vm8 = vmmov 0   ;;  %v228_v24 = vld [vmem:[#allocation2 + $0x38] sm:$0xff]  ;;  %v227_v25 = vld [vmem:[#allocation2 + $0x30] sm:$0xff] }
  0x14   :  { %v177_v14 = vsel %vm175_vm7, 1, %v463_v4  ;;  %361 = vmatprep.subr.mxu0 %v464_v15  ;;  %393 = vmatprep.mubr.msk.f32.mxu0 %vm465_vm8, %v464_v15  ;;  %v226_v26 = vld [vmem:[#allocation2 + $0x28] sm:$0xff]  ;;  %v225_v27 = vld [vmem:[#allocation2 + $0x20] sm:$0xff]  ;;  %v224_v28 = vld [vmem:[#allocation2 + $0x18] sm:$0xff]  ;;  %s466_s3 = smov [#allocation5]  }
  0x15   :  { %131 = vperm.xlu1 %405, %v99_v7   ;;  %407 = vset.pattern.permute.xlu0 %v463_v4  ;;  %v223_v29 = vld [vmem:[#allocation2 + $0x10] sm:$0xff]  ;;  %v222_v30 = vld [vmem:[#allocation2 + $0x8] sm:$0xff]  ;;  %v221_v31 = vld [vmem:[#allocation2] sm:$0xff]  ;;  %s319_s24 = sshll.u32 %s466_s3, 4  ;;  %s320_s24 = int_to_ptr.vmem [resolvable:$true] %s319_s24 }
  0x16   :  { %41 = vperm.xlu0 %407, %v39_v8   ;;  %362 = vmatpush3.msra.mxu0 %v236_v16  ;;  %v334_v39 = vld [vmem:[%s547_s1 + $0x6] ss:$0 sm:$0xff]  ;;  %v335_v41 = vld [vmem:[%s547_s1 + $0x7] ss:$0 sm:$0xff]  ;;  %v329_v43 = vld [vmem:[%s547_s1] ss:$0 sm:$0xff]  ;;  %p439_p6 = scmp.lt.s32.totalorder %s320_s24, %s320_s24 }
  0x17   :  { %363 = vmatprep.subr.mxu0 %v464_v15  ;;  %v328_v44 = vld [vmem:[%s547_s1 + $0x2] ss:$0 sm:$0xff]  ;;  %v330_v45 = vld [vmem:[%s547_s1 + $0x1] ss:$0 sm:$0xff]  ;;  %v336_v47 = vld [vmem:[%s547_s1 + $0x8] ss:$0 sm:$0xff] }
  0x18   :  { %364 = vmatpush3.msra.mxu0 %v235_v17  ;;  %v331_v51 = vld [vmem:[%s547_s1 + $0x3] ss:$0 sm:$0xff]  ;;  %v337_v54 = vld [vmem:[%s547_s1 + $0x9] ss:$0 sm:$0xff]  ;;  %v332_v55 = vld [vmem:[%s547_s1 + $0x4] ss:$0 sm:$0xff] }
  0x19   :  { %409 = vset.pattern.permute.xlu1 %v463_v4  ;;  %365 = vmatprep.subr.mxu0 %v464_v15  ;;  %v333_v57 = vld [vmem:[%s547_s1 + $0x5] ss:$0 sm:$0xff]  ;;  %v338_v58 = vld [vmem:[%s547_s1 + $0xa] ss:$0 sm:$0xff]  ;;  %v339_v3 = vld [vmem:[%s547_s1 + $0xb] ss:$0 sm:$0xff] }
  0x1a   :  { %408 = vset.pattern.permute.xlu0 %v461_v0  ;;  %68 = vperm.xlu1 %409, %v36_v9   ;;  %s434_s25 = scalar_lea.vmem %s320_s24, 128 }
  0x1b   :  { %111 = vperm.xlu0 %408, %v75_v6   ;;  %366 = vmatpush3.msra.mxu0 %v234_v18  ;;  %p435_p5 = scmp.ne.s32.totalorder %s320_s24, %s434_s25  ;;  %p440_p7 = scmp.lt.s32.totalorder %s434_s25, %s434_s25 }
  0x1c   :  { %367 = vmatprep.subr.mxu0 %v464_v15 }
  0x1d   :  { %368 = vmatpush3.msra.mxu0 %v233_v19  ;;  %p441_p8 = por %p440_p7, %p439_p6 }
  0x1e   :  { %62 = vperm.xlu1 %409, %v59_v10   ;;  %369 = vmatprep.subr.mxu0 %v464_v15 }
  0x1f   :  { %143 = vperm.xlu0 %408, %v141_v11   ;;  %370 = vmatpush3.msra.mxu0 %v232_v20  ;;  %p442_p9 = pnand %p441_p8, %p435_p5 }
  0x20   :  { %371 = vmatprep.subr.mxu0 %v464_v15 }
  0x21   :  { %372 = vmatpush3.msra.mxu0 %v231_v21 }
  0x22   :  { %410 = vset.pattern.permute.xlu1 %v462_v1  ;;  %373 = vmatprep.subr.mxu0 %v464_v15 }
  0x23   :  { %89 = vperm.xlu1 %410, %v87_v5   ;;  %167 = vperm.xlu0 %408, %v165_v12   ;;  %v340_v5 = vld [vmem:[%s547_s1 + $0xc] ss:$0 sm:$0xff] }
  0x24   :  { %374 = vmatpush3.msra.mxu0 %v230_v22 }
  0x25   :  { %375 = vmatprep.subr.mxu0 %v464_v15 }
  0x26   :  { %376 = vmatpush3.msra.mxu0 %v229_v23 }
  0x27   :  { %101 = vperm.xlu1 %410, %v99_v7   ;;  %377 = vmatprep.subr.mxu0 %v464_v15 }
  0x28   :  { %378 = vmatpush3.msra.mxu0 %v228_v24 }
  0x29   :  { %379 = vmatprep.subr.mxu0 %v464_v15 }
  0x2a   :  { %380 = vmatpush3.msra.mxu0 %v227_v25 }
  0x2b   :  { %411 = vset.pattern.permute.xlu1 %v461_v0  ;;  %381 = vmatprep.subr.mxu0 %v464_v15 }
  0x2c   :  { %155 = vperm.xlu1 %411, %v153_v13   ;;  %382 = vmatpush3.msra.mxu0 %v226_v26 }
  0x2d   :  { %383 = vmatprep.subr.mxu0 %v464_v15 }
  0x2e   :  { %384 = vmatpush3.msra.mxu0 %v225_v27 }
  0x2f   :  { %385 = vmatprep.subr.mxu0 %v464_v15 }
  0x30   :  { %179 = vperm.xlu1 %411, %v177_v14   ;;  %386 = vmatpush3.msra.mxu0 %v224_v28 }
  0x31   :  { %387 = vmatprep.subr.mxu0 %v464_v15 }
  0x32   :  { %388 = vmatpush3.msra.mxu0 %v223_v29  ;;  %v341_v29 = vld [vmem:[%s548_s2] ss:$0 sm:$0xff] }
  0x33   :  { %389 = vmatprep.subr.mxu0 %v464_v15 }
  0x34   :  { %390 = vmatpush3.msra.mxu0 %v222_v30 }
  0x35   :  { %391 = vmatprep.subr.mxu0 %v464_v15 }
  0x36   :  { %392 = vmatpush3.msra.mxu0 %v221_v31  ;;  %v342_v31 = vld [vmem:[%s548_s2 + $0x1] ss:$0 sm:$0xff] }
  0x8c   :  { %v122_v32 = vpop.permute.xlu1 %121  ;;  %v78_v33 = vpop.permute.xlu0 %77 }
  0x8d   :  { %vm123_vm10 = vcmp.eq.s32.totalorder %v122_v32, 1  ;;  %vm79_vm12 = vcmp.eq.s32.totalorder %v78_v33, 1 }
  0x8e   :  { %v84_v59 = vsel %vm79_vm12, %v331_v51, 0.0 }
  0x90   :  { %v132_v34 = vpop.permute.xlu1 %131 }
  0x91   :  { %v42_v35 = vpop.permute.xlu0 %41  ;;  %vm133_vm13 = vcmp.eq.s32.totalorder %v132_v34, 1 }
  0x92   :  { %vm43_vm11 = vcmp.eq.s32.totalorder %v42_v35, 1  ;;  %v343_v35 = vld [vmem:[#allocation2 + $0x80] ss:$0 sm:$0xff] }
  0x93   :  { %v52_v50 = vsel %vm43_vm11, %v328_v44, %v329_v43  ;;  %v58_v52 = vsel %vm43_vm11, %v328_v44, %v330_v45 }
  0x95   :  { %v69_v36 = vpop.permute.xlu1 %68 }
  0x96   :  { %v112_v37 = vpop.permute.xlu0 %111  ;;  %v71_v61 = vmul.f32 %v69_v36, %v58_v52 }
  0x97   :  { %vm113_vm9 = vcmp.eq.s32.totalorder %v112_v37, 1 }
  0x98   :  { %v118_v42 = vsel %vm113_vm9, %v334_v39, 0.0 }
  0x99   :  { %v63_v38 = vpop.permute.xlu1 %62  ;;  %v128_v46 = vsel %vm123_vm10, %v335_v41, %v118_v42 }
  0x9a   :  { %v144_v48 = vpop.permute.xlu0 %143  ;;  %v138_v53 = vsel %vm133_vm13, %v336_v47, %v128_v46  ;;  %v65_v56 = vmul.f32 %v63_v38, %v52_v50 }
  0x9b   :  { %vm145_vm14 = vcmp.eq.s32.totalorder %v144_v48, 1 }
  0x9c   :  { %v150_v62 = vsel %vm145_vm14, %v337_v54, %v138_v53  ;;  %v72_v4 = vadd.f32 %v71_v61, %v65_v56 }
  0x9e   :  { %v90_v40 = vpop.permute.xlu1 %89  ;;  %v168_v0 = vpop.permute.xlu0 %167 }
  0x9f   :  { %vm91_vm15 = vcmp.eq.s32.totalorder %v90_v40, 1  ;;  %vm169_vm2 = vcmp.eq.s32.totalorder %v168_v0, 1 }
  0xa0   :  { %v96_v63 = vsel %vm91_vm15, %v332_v55, %v84_v59 }
  0xa2   :  { %v102_v49 = vpop.permute.xlu1 %101 }
  0xa3   :  { %vm103_vm0 = vcmp.eq.s32.totalorder %v102_v49, 1 }
  0xa4   :  { %v108_v1 = vsel %vm103_vm0, %v333_v57, %v96_v63 }
  0xa5   :  { %v187_v7 = vadd.f32 %v108_v1, %v72_v4 }
  0xa7   :  { %v156_v60 = vpop.permute.xlu1 %155 }
  0xa8   :  { %vm157_vm1 = vcmp.eq.s32.totalorder %v156_v60, 1 }
  0xa9   :  { %v162_v2 = vsel %vm157_vm1, %v338_v58, %v150_v62 }
  0xaa   :  { %v174_v8 = vsel %vm169_vm2, %v339_v3, %v162_v2 }
  0xab   :  { %v180_v6 = vpop.permute.xlu1 %179 }
  0xac   :  { %vm181_vm3 = vcmp.eq.s32.totalorder %v180_v6, 1 }
  0xad   :  { %v186_v9 = vsel %vm181_vm3, %v340_v5, %v174_v8 }
  0xae   :  { %v188_v10 = vadd.f32 %v187_v7, %v186_v9 }
  0xb0   :  { %v189_v11 = vrot.slane %v188_v10, 4 }
  0xb2   :  { %v190_v12 = vadd.f32 %v189_v11, %v188_v10 }
  0xb4   :  { %v191_v13 = vrot.slane %v190_v12, 2 }
  0xb6   :  { %v192_v14 = vadd.f32 %v191_v13, %v190_v12 }
  0xb8   :  { %v193_v15 = vrot.slane %v192_v14, 1 }
  0xba   :  { %v194_v16 = vadd.f32 %v193_v15, %v192_v14 }
  0xbc   :  { %v195_v17 = vmul.f32 0.125, %v194_v16 }
  0xbe   :  { %v196_v18 = vsub.f32 %v188_v10, %v195_v17 }
  0xc0   :  { %v197_v19 = vmul.f32 %v196_v18, %v196_v18 }
  0xc2   :  { %v198_v20 = vrot.slane %v197_v19, 4 }
  0xc4   :  { %v199_v21 = vadd.f32 %v198_v20, %v197_v19 }
  0xc6   :  { %v200_v22 = vrot.slane %v199_v21, 2 }
  0xc8   :  { %v201_v23 = vadd.f32 %v200_v22, %v199_v21 }
  0xca   :  { %v202_v24 = vrot.slane %v201_v23, 1 }
  0xcc   :  { %v203_v25 = vadd.f32 %v202_v24, %v201_v23 }
  0xce   :  { %v204_v26 = vmul.f32 0.125, %v203_v25 }
  0xd0   :  { %v205_v27 = vadd.f32 1e-05, %v204_v26 }
  0xd2   :  { %412 = vrsqrt.f32 %v205_v27 }
  0xdf   :  { %v413_v28 = vpop.eup %412 }
  0xe0   :  { %v207_v30 = vmul.f32 %v413_v28, %v196_v18 }
  0xe2   :  { %v213_v32 = vmul.f32 %v341_v29, %v207_v30 }
  0xe4   :  { %v219_v33 = vadd.f32 %v342_v31, %v213_v32 }
  0xe6   :  { %v220_v34 = vmax.f32 %v219_v33, 0.0 }
  0xe8   :  { %394 = vmatmul.mubr.f32.vlgmr.msra.gmra.mxu0 %v220_v34 }
 0x1a8   :  { %v308_v36 = vpop.f32.mrf.mxu0 }
 0x1a9   :  { %v309_v37 = vadd.f32 %v343_v35, %v308_v36 }
 0x1aa   :  { %v395_v38 = vpop.f32.mrf.mxu0 }
 0x1ab   :  { %312 = vst [vmem:[#allocation5] sm:$0xff] %v309_v37 }
 0x1ac   :  { %445 = shalt.err (!%p442_p9)
}
 0x1ad   :  { %322 = dma.vmem_to_hbm [thread:$0]  %s320_s24, 128, %s550_s4, [#allocation4]  }
 0x1ae   :  { %456 = dma.done.wait [#allocation4], 128  }
 0x1af   :  { %457 = vsyncadd [#allocation4], 4294967168 }
 0x1b0   :  { %326 = vsyncpa [#allocation3], 1 }
 0x1b1   :  { %327 = vsyncpa [#allocation4], 1 }

</bundles_post_ra>
